<compile_context>
chip_gen: v7x
topology: tpu7x:2x2x1
jax: 0.10.0
libtpu: 0.0.40
codegen_flags: <defaults>
</compile_context>

<pallas_src>
import functools

import jax
import jax.numpy as jnp
from jax.experimental import pallas as pl
from jax.experimental.pallas import tpu as pltpu


def _ntd_partials_kernel(logits_ref, dg_ref, tgt_ref, out_ref, *,
                         inv_tau, batch, needs_mask, fold):
    """Per-sample partials, folded to 128 lanes per block when possible.

    out[0, :] = per-group sums of CE_i, out[1, :] = per-group sums of KL_nt_i
    (unscaled; tau^2 / beta / 1/B applied in the wrapper).
    """
    C, TB = logits_ref.shape
    logits = logits_ref[...].astype(jnp.float32)            # (C, TB)
    dg = dg_ref[...].astype(jnp.float32)                    # (C, TB)
    tgt = tgt_ref[...]                                       # (1, TB) int32

    if needs_mask:
        col = (jax.lax.broadcasted_iota(jnp.int32, (1, TB), 1)
               + pl.program_id(0) * TB)
        valid = col < batch                                   # (1, TB)
        # Zero out-of-bounds garbage BEFORE any exp/log so NaN/Inf cannot appear.
        logits = jnp.where(valid, logits, 0.0)
        dg = jnp.where(valid, dg, 0.0)

    true_mask = jax.lax.broadcasted_iota(jnp.int32, (C, TB), 0) == tgt  # (C, TB)

    it = jnp.float32(inv_tau)
    neg = jnp.float32(-1e30)

    # ---- CrossEntropy per sample: lse(logits) - logits[target] ----
    m = jnp.max(logits, axis=0, keepdims=True)
    lse = m + jnp.log(jnp.sum(jnp.exp(logits - m), axis=0, keepdims=True))
    true_logit = jnp.sum(jnp.where(true_mask, logits, 0.0), axis=0, keepdims=True)
    ce_row = lse - true_logit                                 # (1, TB)

    # ---- teacher (no-grad) softmax over the not-true classes ----
    # Mask the true class with a huge negative: its softmax weight is exactly 0,
    # so the softmax over the remaining classes matches the gathered reference.
    d = jnp.where(true_mask, neg, dg * it)
    dm = jnp.max(d, axis=0, keepdims=True)
    exp_d = jnp.exp(d - dm)
    sum_d = jnp.sum(exp_d, axis=0, keepdims=True)
    d_lse = dm + jnp.log(sum_d)
    dg_p = exp_d * pl.reciprocal(sum_d, approx=False)         # teacher softmax

    # ---- student log-sum-exp over the not-true classes ----
    s = jnp.where(true_mask, neg, logits * it)
    sm = jnp.max(s, axis=0, keepdims=True)
    s_lse = sm + jnp.log(jnp.sum(jnp.exp(s - sm), axis=0, keepdims=True))

    # KL_i = sum_j p_j*(d_j - s_j) + (s_lse - d_lse)   (uses sum_j p_j = 1).
    # For not-true classes d_j - s_j == (dg_j - logits_j)/tau; the true column
    # contributes exactly 0 (p_j = 0 and the diff is masked to 0).
    diff = jnp.where(true_mask, 0.0, (dg - logits) * it)
    kl_row = jnp.sum(dg_p * diff, axis=0, keepdims=True) + (s_lse - d_lse)  # (1, TB)

    if needs_mask:
        ce_row = jnp.where(valid, ce_row, 0.0)
        kl_row = jnp.where(valid, kl_row, 0.0)

    if fold:
        # Fold TB lanes into 128 lane-groups (static, lane-aligned slices -> cheap
        # VPU adds; keeps the output lane-dense and ~TB/128x smaller).
        G = TB // 128
        ce_o = ce_row[:, 0:128]
        kl_o = kl_row[:, 0:128]
        for g in range(1, G):
            lo = g * 128
            hi = lo + 128
            ce_o = ce_o + ce_row[:, lo:hi]
            kl_o = kl_o + kl_row[:, lo:hi]
        out_ref[0:1, :] = ce_o
        out_ref[1:2, :] = kl_o
    else:
        out_ref[0:1, :] = ce_row
        out_ref[1:2, :] = kl_row


def ntd_loss(logits, targets, dg_logits, *, num_classes=10, tau=3.0, beta=1.0,
             block_b=32768):
    """NTD_Loss.forward: CE(logits, targets) + beta * tau^2 * KL_nt(student || teacher)."""
    B, C = logits.shape
    assert C == num_classes
    assert dg_logits.shape == (B, C)

    # Lane-dense class-major layout: classes on sublanes, batch on the 128-wide lanes.
    lt = logits.T                                             # (C, B), original dtype kept
    dgt = dg_logits.T                                         # (C, B)
    tg = targets.reshape(1, B).astype(jnp.int32)              # (1, B)

    if B <= block_b:
        tb = B
        num_blocks = 1
    else:
        assert block_b % 128 == 0, "block_b must be a multiple of 128 when B > block_b"
        tb = block_b
        num_blocks = pl.cdiv(B, tb)

    needs_mask = (num_blocks * tb != B)                       # tail columns need masking
    fold = (tb % 128 == 0) and (tb >= 128)                    # fold lanes to 128 per block
    out_w = 128 if fold else tb
    out_cols = out_w * num_blocks

    in_itemsize = jnp.dtype(logits.dtype).itemsize
    cost = pl.CostEstimate(
        flops=int(30 * B * C),
        transcendentals=int(3 * B * C + 4 * B),
        bytes_accessed=int(2 * B * C * in_itemsize + 4 * B + 4 * 2 * out_cols),
    )

    kernel = functools.partial(
        _ntd_partials_kernel,
        inv_tau=1.0 / float(tau), batch=B, needs_mask=needs_mask, fold=fold)

    partials = pl.pallas_call(
        kernel,
        out_shape=jax.ShapeDtypeStruct((2, out_cols), jnp.float32),
        grid=(num_blocks,),
        in_specs=[
            pl.BlockSpec((C, tb), lambda i: (0, i)),
            pl.BlockSpec((C, tb), lambda i: (0, i)),
            pl.BlockSpec((1, tb), lambda i: (0, i)),
        ],
        out_specs=pl.BlockSpec((2, out_w), lambda i: (0, i)),
        compiler_params=pltpu.CompilerParams(
            dimension_semantics=("parallel",),
            vmem_limit_bytes=48 * 1024 * 1024,
        ),
        cost_estimate=cost,
    )(lt, dgt, tg)

    # Tiny final reduction + normalization (kept in the wrapper so the grid axis
    # stays independent / parallel-shardable; masked columns contribute exactly 0).
    ce = jnp.sum(partials[0]) / B
    kl = jnp.sum(partials[1]) / B
    return ce + jnp.float32(beta) * jnp.float32(tau) ** 2 * kl


def _ntd_loss_ref(logits, targets, dg_logits, num_classes=10, tau=3.0, beta=1.0):
    """Pure-JAX reference mirroring the PyTorch module (gathered not-true classes)."""
    B = logits.shape[0]
    ce = jnp.mean(
        jax.nn.logsumexp(logits, axis=1)
        - jnp.take_along_axis(logits, targets[:, None], axis=1)[:, 0]
    )
    cls = jnp.arange(num_classes)[None, :]
    not_true = cls != targets[:, None]                        # (B, C), C-1 True per row
    # Gather indices of the not-true classes (order within a row is irrelevant for
    # softmax/log_softmax/KL, which are permutation invariant over the class axis).
    nt_idx = jnp.argsort(jnp.where(not_true, 0, 1), axis=1)[:, :num_classes - 1]
    nt = jnp.take_along_axis(logits, nt_idx, axis=1)
    dg_nt = jnp.take_along_axis(dg_logits, nt_idx, axis=1)
    pred_logp = jax.nn.log_softmax(nt / tau, axis=1)
    dg_p = jax.nn.softmax(dg_nt / tau, axis=1)
    kl = jnp.sum(dg_p * (jnp.log(dg_p) - pred_logp)) / B
    return ce + beta * (tau ** 2) * kl


if __name__ == "__main__":
    num_classes = 10
    tau, beta = 3.0, 1.0
    key = jax.random.PRNGKey(0)

    # Small shape matching the module defaults (note: at B=8 the call is pure
    # launch/DMA overhead -- amortize by batching many samples per call in practice).
    B = 8
    k1, k2, k3 = jax.random.split(key, 3)
    logits = jax.random.normal(k1, (B, num_classes), dtype=jnp.float32)
    dg_logits = jax.random.normal(k2, (B, num_classes), dtype=jnp.float32)
    targets = jax.random.randint(k3, (B,), 0, num_classes, dtype=jnp.int32)

    loss = ntd_loss(logits, targets, dg_logits, num_classes=num_classes, tau=tau, beta=beta)
    jax.block_until_ready(loss)
    ref = _ntd_loss_ref(logits, targets, dg_logits, num_classes=num_classes, tau=tau, beta=beta)
    assert jnp.allclose(loss, ref, atol=1e-4, rtol=1e-4), (loss, ref)

    # Second check: multi-block grid, in-kernel tail masking (no padding of inputs),
    # and the folded (2, 128)-per-block partials path.
    B2 = 300
    k4, k5, k6 = jax.random.split(jax.random.PRNGKey(0), 3)
    logits2 = jax.random.normal(k4, (B2, num_classes), dtype=jnp.float32)
    dg_logits2 = jax.random.normal(k5, (B2, num_classes), dtype=jnp.float32)
    targets2 = jax.random.randint(k6, (B2,), 0, num_classes, dtype=jnp.int32)

    loss2 = ntd_loss(logits2, targets2, dg_logits2, num_classes=num_classes,
                     tau=tau, beta=beta, block_b=128)
    jax.block_until_ready(loss2)
    ref2 = _ntd_loss_ref(logits2, targets2, dg_logits2, num_classes=num_classes,
                         tau=tau, beta=beta)
    assert jnp.allclose(loss2, ref2, atol=1e-4, rtol=1e-4), (loss2, ref2)

    # Third check: bf16 inputs (kernel upcasts internally); reference computed on the
    # same bf16-rounded values, so agreement should stay at f32 accumulation accuracy.
    logits_bf = logits2.astype(jnp.bfloat16)
    dg_bf = dg_logits2.astype(jnp.bfloat16)
    loss3 = ntd_loss(logits_bf, targets2, dg_bf, num_classes=num_classes,
                     tau=tau, beta=beta, block_b=128)
    jax.block_until_ready(loss3)
    ref3 = _ntd_loss_ref(logits_bf.astype(jnp.float32), targets2,
                         dg_bf.astype(jnp.float32), num_classes=num_classes,
                         tau=tau, beta=beta)
    assert jnp.allclose(loss3, ref3, atol=1e-3, rtol=1e-3), (loss3, ref3)

    print("KERNEL_OK")
</pallas_src>

<mosaic_0001>
module attributes {stable_mosaic.version = 11 : i64} {
  func.func @_ntd_partials_kernel(%arg0: i32, %arg1: memref<10x8xf32, #tpu.memory_space<vmem>>, %arg2: memref<10x8xf32, #tpu.memory_space<vmem>>, %arg3: memref<1x8xi32, #tpu.memory_space<vmem>>, %arg4: memref<2x8xf32, #tpu.memory_space<vmem>>) attributes {dimension_semantics = [#tpu.dimension_semantics<parallel>], iteration_bounds = array<i64: 1>, scalar_prefetch = 0 : i64, scratch_operands = 0 : i64, tpu.core_type = #tpu.core_type<tc>, window_params = [{transform_indices = @transform_0, window_bounds = array<i64: 10, 8>}, {transform_indices = @transform_1, window_bounds = array<i64: 10, 8>}, {transform_indices = @transform_2, window_bounds = array<i64: 1, 8>}, {transform_indices = @transform_3, window_bounds = array<i64: 2, 8>}]} {
    %c0 = arith.constant 0 : index
    %c0_0 = arith.constant 0 : index
    %0 = vector.load %arg1[%c0, %c0_0] : memref<10x8xf32, #tpu.memory_space<vmem>>, vector<10x8xf32>
    %c0_1 = arith.constant 0 : index
    %c0_2 = arith.constant 0 : index
    %1 = vector.load %arg2[%c0_1, %c0_2] : memref<10x8xf32, #tpu.memory_space<vmem>>, vector<10x8xf32>
    %c0_3 = arith.constant 0 : index
    %c0_4 = arith.constant 0 : index
    %2 = vector.load %arg3[%c0_3, %c0_4] : memref<1x8xi32, #tpu.memory_space<vmem>>, vector<1x8xi32>
    %3 = tpu.iota {dimensions = array<i32: 0>} : vector<10x8xi32>
    %4 = vector.broadcast %2 : vector<1x8xi32> to vector<10x8xi32>
    %5 = arith.cmpi eq, %3, %4 : vector<10x8xi32>
    %cst = arith.constant dense<0xFF800000> : vector<8xf32>
    %6 = vector.multi_reduction <maximumf>, %0, %cst [0] : vector<10x8xf32> to vector<8xf32>
    %7 = vector.shape_cast %6 : vector<8xf32> to vector<1x8xf32>
    %8 = vector.broadcast %7 : vector<1x8xf32> to vector<10x8xf32>
    %9 = arith.subf %0, %8 : vector<10x8xf32>
    %10 = math.exp %9 : vector<10x8xf32>
    %cst_5 = arith.constant dense<0.000000e+00> : vector<8xf32>
    %11 = vector.multi_reduction <add>, %10, %cst_5 [0] : vector<10x8xf32> to vector<8xf32>
    %12 = vector.shape_cast %11 : vector<8xf32> to vector<1x8xf32>
    %13 = math.log %12 : vector<1x8xf32>
    %14 = arith.addf %7, %13 : vector<1x8xf32>
    %cst_6 = arith.constant 0.000000e+00 : f32
    %15 = vector.broadcast %cst_6 : f32 to vector<10x8xf32>
    %16 = arith.select %5, %0, %15 : vector<10x8xi1>, vector<10x8xf32>
    %cst_7 = arith.constant dense<0.000000e+00> : vector<8xf32>
    %17 = vector.multi_reduction <add>, %16, %cst_7 [0] : vector<10x8xf32> to vector<8xf32>
    %18 = vector.shape_cast %17 : vector<8xf32> to vector<1x8xf32>
    %19 = arith.subf %14, %18 : vector<1x8xf32>
    %cst_8 = arith.constant 0.333333343 : f32
    %20 = vector.broadcast %cst_8 : f32 to vector<10x8xf32>
    %21 = arith.mulf %1, %20 : vector<10x8xf32>
    %cst_9 = arith.constant -1.000000e+30 : f32
    %22 = vector.broadcast %cst_9 : f32 to vector<10x8xf32>
    %23 = arith.select %5, %22, %21 : vector<10x8xi1>, vector<10x8xf32>
    %cst_10 = arith.constant dense<0xFF800000> : vector<8xf32>
    %24 = vector.multi_reduction <maximumf>, %23, %cst_10 [0] : vector<10x8xf32> to vector<8xf32>
    %25 = vector.shape_cast %24 : vector<8xf32> to vector<1x8xf32>
    %26 = vector.broadcast %25 : vector<1x8xf32> to vector<10x8xf32>
    %27 = arith.subf %23, %26 : vector<10x8xf32>
    %28 = math.exp %27 : vector<10x8xf32>
    %cst_11 = arith.constant dense<0.000000e+00> : vector<8xf32>
    %29 = vector.multi_reduction <add>, %28, %cst_11 [0] : vector<10x8xf32> to vector<8xf32>
    %30 = vector.shape_cast %29 : vector<8xf32> to vector<1x8xf32>
    %31 = math.log %30 : vector<1x8xf32>
    %32 = arith.addf %25, %31 : vector<1x8xf32>
    %33 = tpu.reciprocal %30 : vector<1x8xf32> -> vector<1x8xf32>
    %34 = vector.broadcast %33 : vector<1x8xf32> to vector<10x8xf32>
    %35 = arith.mulf %28, %34 : vector<10x8xf32>
    %cst_12 = arith.constant 0.333333343 : f32
    %36 = vector.broadcast %cst_12 : f32 to vector<10x8xf32>
    %37 = arith.mulf %0, %36 : vector<10x8xf32>
    %cst_13 = arith.constant -1.000000e+30 : f32
    %38 = vector.broadcast %cst_13 : f32 to vector<10x8xf32>
    %39 = arith.select %5, %38, %37 : vector<10x8xi1>, vector<10x8xf32>
    %cst_14 = arith.constant dense<0xFF800000> : vector<8xf32>
    %40 = vector.multi_reduction <maximumf>, %39, %cst_14 [0] : vector<10x8xf32> to vector<8xf32>
    %41 = vector.shape_cast %40 : vector<8xf32> to vector<1x8xf32>
    %42 = vector.broadcast %41 : vector<1x8xf32> to vector<10x8xf32>
    %43 = arith.subf %39, %42 : vector<10x8xf32>
    %44 = math.exp %43 : vector<10x8xf32>
    %cst_15 = arith.constant dense<0.000000e+00> : vector<8xf32>
    %45 = vector.multi_reduction <add>, %44, %cst_15 [0] : vector<10x8xf32> to vector<8xf32>
    %46 = vector.shape_cast %45 : vector<8xf32> to vector<1x8xf32>
    %47 = math.log %46 : vector<1x8xf32>
    %48 = arith.addf %41, %47 : vector<1x8xf32>
    %49 = arith.subf %1, %0 : vector<10x8xf32>
    %cst_16 = arith.constant 0.333333343 : f32
    %50 = vector.broadcast %cst_16 : f32 to vector<10x8xf32>
    %51 = arith.mulf %49, %50 : vector<10x8xf32>
    %cst_17 = arith.constant 0.000000e+00 : f32
    %52 = vector.broadcast %cst_17 : f32 to vector<10x8xf32>
    %53 = arith.select %5, %52, %51 : vector<10x8xi1>, vector<10x8xf32>
    %54 = arith.mulf %35, %53 : vector<10x8xf32>
    %cst_18 = arith.constant dense<0.000000e+00> : vector<8xf32>
    %55 = vector.multi_reduction <add>, %54, %cst_18 [0] : vector<10x8xf32> to vector<8xf32>
    %56 = vector.shape_cast %55 : vector<8xf32> to vector<1x8xf32>
    %57 = arith.subf %48, %32 : vector<1x8xf32>
    %58 = arith.addf %56, %57 : vector<1x8xf32>
    %c0_19 = arith.constant 0 : index
    %c0_20 = arith.constant 0 : index
    %59 = vector.load %arg4[%c0_19, %c0_20] : memref<2x8xf32, #tpu.memory_space<vmem>>, vector<1x8xf32>
    tpu.vector_store %arg4[%c0_19, %c0_20], %19 {strides = array<i32>} : memref<2x8xf32, #tpu.memory_space<vmem>>, vector<1x8xf32>,
    %c1 = arith.constant 1 : index
    %c0_21 = arith.constant 0 : index
    %60 = vector.load %arg4[%c1, %c0_21] : memref<2x8xf32, #tpu.memory_space<vmem>>, vector<1x8xf32>
    tpu.vector_store %arg4[%c1, %c0_21], %58 {strides = array<i32>} : memref<2x8xf32, #tpu.memory_space<vmem>>, vector<1x8xf32>,
    return
  }
  func.func @transform_0(%arg0: i32) -> (i32, i32) {
    %c0_i32 = arith.constant 0 : i32
    %c0_i32_0 = arith.constant 0 : i32
    return %c0_i32, %arg0 : i32, i32
  }
  func.func @transform_1(%arg0: i32) -> (i32, i32) {
    %c0_i32 = arith.constant 0 : i32
    %c0_i32_0 = arith.constant 0 : i32
    return %c0_i32, %arg0 : i32, i32
  }
  func.func @transform_2(%arg0: i32) -> (i32, i32) {
    %c0_i32 = arith.constant 0 : i32
    %c0_i32_0 = arith.constant 0 : i32
    return %c0_i32, %arg0 : i32, i32
  }
  func.func @transform_3(%arg0: i32) -> (i32, i32) {
    %c0_i32 = arith.constant 0 : i32
    %c0_i32_0 = arith.constant 0 : i32
    return %c0_i32, %arg0 : i32, i32
  }
}

</mosaic_0001>

<bundles_post_ra>
// kernel: tpu_custom_call.1
= control target key start
LH: loop header
LB: loop body
LE: loop exit
PB: predicated region body
PF: predicated region fallthrough
CT: control target
= control target key end

     0   :  { %v20_v3 = vlaneseq  ;;  %vm29_vm0 = vcmask 64512   ;;  %vm31_vm1 = vcmask 58368   ;;  %s355_s0 = inlined_call_operand.vmem [shape: f32[10,8], index: 0, kind: input, shape index: {}]   ;;  %s356_s1 = inlined_call_operand.vmem [shape: f32[10,8], index: 1, kind: input, shape index: {}]   ;;  %s357_s2 = inlined_call_operand.vmem [shape: s32[1,8], index: 2, kind: input, shape index: {}]   ;;  %s358_s3 = inlined_call_operand.hbm [shape: f32[2,8], index: 3, kind: output, shape index: {}]  }
   0x1   :  { %v241_v0 = vld [vmem:[%s355_s0] sm:$0xff]  ;;  %v246_v1 = vld [vmem:[%s355_s0 + $0x8] sm:$0x3] }
   0x2   :  { %v251_v2 = vld [vmem:[%s357_s2] ss:$0 sm:$0xff]  ;;  %v30_v4 = vsel %vm29_vm0, %v241_v0, -inf  ;;  %v263_v6 = vld [vmem:[%s356_s1 + $0x8] sm:$0x3]  ;;  %v265_v7 = vshrl.u32 %v20_v3, 7 }
   0x3   :  { %v258_v5 = vld [vmem:[%s356_s1] sm:$0xff]  ;;  %v32_v8 = vsel %vm31_vm1, %v246_v1, -inf  ;;  %v71_v10 = vmul.f32 0.33333334, %v263_v6  ;;  %v104_v12 = vmul.f32 0.33333334, %v241_v0 }
   0x4   :  { %v70_v9 = vmul.f32 0.33333334, %v258_v5  ;;  %v33_v11 = vmax.f32 %v30_v4, %v32_v8  ;;  %v105_v13 = vmul.f32 0.33333334, %v246_v1 }
   0x5   :  { %8 = vsyncpa [#allocation3], 0  ;;  %v274_v14 = vadd.s32 8, %v265_v7  ;;  %vm27_vm2 = vcmp.eq.s32.totalorder %v265_v7, %v251_v2  ;;  %vm154_vm4 = vcmask 57344   ;;  %s217_s0 = smov [#allocation2]  }
   0x6   :  { %v34_v15 = vrot.slane %v33_v11, 4  ;;  %v72_v16 = vsel %vm27_vm2, -1e+30, %v70_v9  ;;  %v106_v17 = vsel %vm27_vm2, -1e+30, %v104_v12  ;;  %v58_v55 = vsel %vm27_vm2, %v241_v0, 0.0 }
   0x7   :  { %vm28_vm3 = vcmp.eq.s32.totalorder %v274_v14, %v251_v2  ;;  %v74_v18 = vsel %vm29_vm0, %v72_v16, -inf  ;;  %v108_v19 = vsel %vm29_vm0, %v106_v17, -inf  ;;  %v60_v60 = vsel %vm29_vm0, %v58_v55, 0.0  ;;  %s163_s1 = sshll.u32 %s217_s0, 4  ;;  %s164_s1 = int_to_ptr.vmem [resolvable:$true] %s163_s1 }
   0x8   :  { %v35_v20 = vmax.f32 %v33_v11, %v34_v15  ;;  %v73_v21 = vsel %vm28_vm3, -1e+30, %v71_v10  ;;  %v107_v22 = vsel %vm28_vm3, -1e+30, %v105_v13  ;;  %v59_v56 = vsel %vm28_vm3, %v246_v1, 0.0  ;;  %s193_s2 = scalar_lea.vmem %s164_s1, 32  ;;  %p198_p1 = scmp.lt.s32.totalorder %s164_s1, %s164_s1 }
   0x9   :  { %v75_v23 = vsel %vm31_vm1, %v73_v21, -inf  ;;  %v109_v24 = vsel %vm31_vm1, %v107_v22, -inf  ;;  %v61_v61 = vsel %vm31_vm1, %v59_v56, 0.0  ;;  %p194_p0 = scmp.ne.s32.totalorder %s164_s1, %s193_s2  ;;  %p199_p2 = scmp.lt.s32.totalorder %s193_s2, %s193_s2 }
   0xa   :  { %v36_v25 = vrot.slane %v35_v20, 2  ;;  %v76_v26 = vmax.f32 %v74_v18, %v75_v23  ;;  %v110_v27 = vmax.f32 %v108_v19, %v109_v24  ;;  %v62_v3 = vadd.f32 %v61_v61, %v60_v60 }
   0xb   :  { %p200_p3 = por %p199_p2, %p198_p1 }
   0xc   :  { %v37_v28 = vmax.f32 %v35_v20, %v36_v25  ;;  %v77_v29 = vrot.slane %v76_v26, 4  ;;  %v111_v30 = vrot.slane %v110_v27, 4  ;;  %v63_v13 = vrot.slane %v62_v3, 4 }
   0xd   :  { %p201_p4 = pnand %p200_p3, %p194_p0 }
   0xe   :  { %v38_v31 = vrot.slane %v37_v28, 1  ;;  %v78_v32 = vmax.f32 %v76_v26, %v77_v29  ;;  %v112_v33 = vmax.f32 %v110_v27, %v111_v30  ;;  %v64_v24 = vadd.f32 %v63_v13, %v62_v3 }
  0x10   :  { %v296_v34 = vmax.f32 %v37_v28, %v38_v31  ;;  %v79_v35 = vrot.slane %v78_v32, 2  ;;  %v113_v36 = vrot.slane %v112_v33, 2  ;;  %v65_v31 = vrot.slane %v64_v24, 2 }
  0x12   :  { %v40_v37 = vsub.f32 %v241_v0, %v296_v34  ;;  %v41_v38 = vsub.f32 %v246_v1, %v296_v34  ;;  %v80_v39 = vmax.f32 %v78_v32, %v79_v35  ;;  %v114_v40 = vmax.f32 %v112_v33, %v113_v36 }
  0x14   :  { %v42_v41 = vmul.f32 1.442695, %v40_v37  ;;  %v44_v42 = vmul.f32 1.442695, %v41_v38  ;;  %v81_v43 = vrot.slane %v80_v39, 1  ;;  %v115_v44 = vrot.slane %v114_v40, 1 }
  0x15   :  { %v66_v37 = vadd.f32 %v65_v31, %v64_v24 }
  0x16   :  { %173 = vpow2.f32 %v42_v41  ;;  %v302_v45 = vmax.f32 %v80_v39, %v81_v43  ;;  %v304_v46 = vmax.f32 %v114_v40, %v115_v44  ;;  %v136_v43 = vsub.f32 %v263_v6, %v246_v1 }
  0x17   :  { %175 = vpow2.f32 %v44_v42  ;;  %v67_v40 = vrot.slane %v66_v37, 1  ;;  %v135_v42 = vsub.f32 %v258_v5, %v241_v0 }
  0x18   :  { %v83_v47 = vsub.f32 %v72_v16, %v302_v45  ;;  %v84_v48 = vsub.f32 %v73_v21, %v302_v45  ;;  %v117_v49 = vsub.f32 %v106_v17, %v304_v46  ;;  %v118_v50 = vsub.f32 %v107_v22, %v304_v46 }
  0x1a   :  { %v85_v51 = vmul.f32 1.442695, %v83_v47  ;;  %v87_v52 = vmul.f32 1.442695, %v84_v48  ;;  %v119_v53 = vmul.f32 1.442695, %v117_v49  ;;  %v68_v48 = vadd.f32 %v67_v40, %v66_v37 }
  0x1b   :  { %v121_v54 = vmul.f32 1.442695, %v118_v50  ;;  %v137_v50 = vmul.f32 0.33333334, %v135_v42 }
  0x1c   :  { %177 = vpow2.f32 %v85_v51  ;;  %v138_v51 = vmul.f32 0.33333334, %v136_v43 }
  0x1d   :  { %179 = vpow2.f32 %v87_v52  ;;  %v139_v0 = vsel %vm27_vm2, 0.0, %v137_v50 }
  0x1e   :  { %181 = vpow2.f32 %v119_v53  ;;  %v140_v1 = vsel %vm28_vm3, 0.0, %v138_v51 }
  0x1f   :  { %183 = vpow2.f32 %v121_v54 }
  0x20   :  { %v174_v57 = vpop.eup %173 }
  0x21   :  { %v176_v58 = vpop.eup %175  ;;  %v46_v59 = vsel %vm29_vm0, %v174_v57, 0.0 }
  0x22   :  { %v47_v62 = vsel %vm31_vm1, %v176_v58, 0.0 }
  0x23   :  { %v48_v63 = vadd.f32 %v47_v62, %v46_v59 }
  0x25   :  { %v49_v4 = vrot.slane %v48_v63, 4 }
  0x26   :  { %v178_v8 = vpop.eup %177 }
  0x27   :  { %v180_v9 = vpop.eup %179  ;;  %v50_v10 = vadd.f32 %v49_v4, %v48_v63  ;;  %v89_v11 = vsel %vm29_vm0, %v178_v8, 0.0 }
  0x28   :  { %v182_v12 = vpop.eup %181  ;;  %v90_v15 = vsel %vm31_vm1, %v180_v9, 0.0 }
  0x29   :  { %v184_v16 = vpop.eup %183  ;;  %v51_v17 = vrot.slane %v50_v10, 2  ;;  %v91_v18 = vadd.f32 %v90_v15, %v89_v11  ;;  %v123_v19 = vsel %vm29_vm0, %v182_v12, 0.0 }
  0x2a   :  { %v124_v20 = vsel %vm31_vm1, %v184_v16, 0.0 }
  0x2b   :  { %v52_v21 = vadd.f32 %v51_v17, %v50_v10  ;;  %v92_v22 = vrot.slane %v91_v18, 4  ;;  %v125_v23 = vadd.f32 %v124_v20, %v123_v19 }
  0x2d   :  { %v53_v25 = vrot.slane %v52_v21, 1  ;;  %v93_v26 = vadd.f32 %v92_v22, %v91_v18  ;;  %v126_v27 = vrot.slane %v125_v23, 4 }
  0x2f   :  { %v54_v28 = vadd.f32 %v53_v25, %v52_v21  ;;  %v94_v29 = vrot.slane %v93_v26, 2  ;;  %v127_v30 = vadd.f32 %v126_v27, %v125_v23 }
  0x31   :  { %185 = vlog2.f32 %v54_v28  ;;  %v95_v32 = vadd.f32 %v94_v29, %v93_v26  ;;  %v128_v33 = vrot.slane %v127_v30, 2 }
  0x33   :  { %v96_v35 = vrot.slane %v95_v32, 1  ;;  %v129_v36 = vadd.f32 %v128_v33, %v127_v30 }
  0x35   :  { %v97_v38 = vadd.f32 %v96_v35, %v95_v32  ;;  %v130_v39 = vrot.slane %v129_v36, 1 }
  0x37   :  { %187 = vrcp.f32 %v97_v38  ;;  %v131_v41 = vadd.f32 %v130_v39, %v129_v36 }
  0x38   :  { %189 = vlog2.f32 %v97_v38 }
  0x39   :  { %191 = vlog2.f32 %v131_v41 }
  0x3b   :  { %v186_v44 = vpop.eup %185 }
  0x3c   :  { %v56_v47 = vmul.f32 0.6931472, %v186_v44 }
  0x3e   :  { %v57_v49 = vadd.f32 %v56_v47, %v296_v34 }
  0x40   :  { %v69_v52 = vsub.f32 %v57_v49, %v68_v48 }
  0x41   :  { %v188_v53 = vpop.eup %187 }
  0x42   :  { %155 = vst.msk [vmem:[#allocation2] sm:$0x1] %vm154_vm4, %v69_v52  ;;  %v102_v5 = vmul.f32 %v188_v53, %v178_v8  ;;  %v103_v6 = vmul.f32 %v188_v53, %v180_v9  ;;  %v190_v34 = vpop.eup %189 }
  0x43   :  { %v192_v56 = vpop.eup %191  ;;  %v99_v60 = vmul.f32 0.6931472, %v190_v34 }
  0x44   :  { %v141_v54 = vmul.f32 %v139_v0, %v102_v5  ;;  %v142_v55 = vmul.f32 %v140_v1, %v103_v6  ;;  %v133_v61 = vmul.f32 0.6931472, %v192_v56 }
  0x45   :  { %v100_v63 = vadd.f32 %v99_v60, %v302_v45 }
  0x46   :  { %v143_v57 = vsel %vm29_vm0, %v141_v54, 0.0  ;;  %v144_v58 = vsel %vm31_vm1, %v142_v55, 0.0  ;;  %v134_v2 = vadd.f32 %v133_v61, %v304_v46 }
  0x47   :  { %v145_v59 = vadd.f32 %v144_v58, %v143_v57 }
  0x48   :  { %v152_v8 = vsub.f32 %v134_v2, %v100_v63 }
  0x49   :  { %v146_v62 = vrot.slane %v145_v59, 4 }
  0x4b   :  { %v147_v7 = vadd.f32 %v146_v62, %v145_v59 }
  0x4d   :  { %v148_v14 = vrot.slane %v147_v7, 2 }
  0x4f   :  { %v149_v3 = vadd.f32 %v148_v14, %v147_v7 }
  0x51   :  { %v150_v4 = vrot.slane %v149_v3, 1 }
  0x53   :  { %v151_v9 = vadd.f32 %v150_v4, %v149_v3 }
  0x55   :  { %v153_v10 = vadd.f32 %v152_v8, %v151_v9 }
  0x57   :  { %156 = vst.msk [vmem:[#allocation2 + $0x1] sm:$0x1] %vm154_vm4, %v153_v10 }
  0x58   :  { %204 = shalt.err (!%p201_p4)
}
  0x59   :  { %s205_s24 = scalar_lea.hbm %s358_s3, 32 }
  0x5a   :  { %p206_p5 = scmp.ne.s32.totalorder %s358_s3, %s205_s24  ;;  %p209_p6 = scmp.lt.u32.totalorder %s205_s24, %s358_s3 }
  0x5c   :  { %p211_p7 = pnand %p209_p6, %p206_p5 }
  0x5e   :  { %214 = shalt.err (!%p211_p7)
}
  0x5f   :  { %166 = dma.vmem_to_hbm [thread:$0]  %s164_s1, 32, %s358_s3, [#allocation3]  }
  0x60   :  { %215 = dma.done.wait [#allocation3], 32  }
  0x61   :  { %216 = vsyncadd [#allocation3], 4294967264 }
  0x62   :  { %170 = vsyncpa [#allocation3], 1 }

</bundles_post_ra>
